<compile_context>
chip_gen: v6e
topology: v6e:2x2x1
jax: 0.10.0
libtpu: 0.0.40
codegen_flags: <defaults>
</compile_context>

<pallas_src>
import jax
import jax.numpy as jnp
from jax import lax
from jax.experimental import pallas as pl
from jax.experimental.pallas import tpu as pltpu

DROPOUT_P = 0.0
NEG_INF = -1e30  # large finite negative; avoids inf-inf NaN in online softmax


def _round_up(x, m):
    return ((x + m - 1) // m) * m


# ---------------------------------------------------------------------------
# Path A: single-pass kernel (whole K/V per grid step, plain softmax).
# ---------------------------------------------------------------------------
def _single_pass_kernel(scale_ref, q_ref, k_ref, v_ref, o_ref):
    q = q_ref[...]                                    # (bb, Sq, D)
    k = k_ref[...]                                    # (bb, Sk, D)
    v = v_ref[...]                                    # (bb, Sk, D)
    scale = scale_ref[0, 0].astype(q.dtype)
    # Fold scale into q (O(Sq*D)) instead of scaling the (Sq, Sk) scores.
    s = jnp.einsum("bqd,bkd->bqk", q * scale, k,
                   preferred_element_type=jnp.float32)        # (bb, Sq, Sk)
    m = jnp.max(s, axis=-1, keepdims=True)
    p = jnp.exp(s - m)
    l = jnp.sum(p, axis=-1, keepdims=True)
    o = jnp.einsum("bqk,bkd->bqd", p.astype(v.dtype), v,
                   preferred_element_type=jnp.float32)
    o_ref[...] = (o * pl.reciprocal(l, approx=True)).astype(o_ref.dtype)


def _sdpa_single_pass(query, key, value, scale):
    B, Sq, D = query.shape
    _, Sk, _ = key.shape
    itemsize = jnp.dtype(query.dtype).itemsize

    # Whole batch in one grid step if it comfortably fits in VMEM,
    # otherwise one batch element per (parallel) grid step.
    per_batch = (2 * Sq * D + 2 * Sk * D) * itemsize + 4 * Sq * (Sk + D)
    bb = B if B * per_batch <= (2 << 20) else 1
    grid = (B // bb,)

    cost = pl.CostEstimate(
        flops=4 * B * Sq * Sk * D,                 # two matmuls
        transcendentals=B * Sq * Sk,               # exp
        bytes_accessed=(2 * Sq * D + 2 * Sk * D) * B * itemsize,
    )

    return pl.pallas_call(
        _single_pass_kernel,
        out_shape=jax.ShapeDtypeStruct((B, Sq, D), query.dtype),
        grid_spec=pltpu.PrefetchScalarGridSpec(
            num_scalar_prefetch=0,
            grid=grid,
            in_specs=[
                pl.BlockSpec(memory_space=pltpu.SMEM),             # scale
                pl.BlockSpec((bb, Sq, D), lambda b: (b, 0, 0)),    # query
                pl.BlockSpec((bb, Sk, D), lambda b: (b, 0, 0)),    # key
                pl.BlockSpec((bb, Sk, D), lambda b: (b, 0, 0)),    # value
            ],
            out_specs=pl.BlockSpec((bb, Sq, D), lambda b: (b, 0, 0)),
        ),
        compiler_params=pltpu.CompilerParams(
            dimension_semantics=("parallel",),
            vmem_limit_bytes=32 * 1024 * 1024,
        ),
        cost_estimate=cost,
    )(scale, query, key, value)


# ---------------------------------------------------------------------------
# Path B: flash-style kernel (online softmax over kv tiles).
# ---------------------------------------------------------------------------
def _make_flash_kernel(sk_actual, tk, needs_mask):
    def kernel(scale_ref, q_ref, k_ref, v_ref, o_ref, qs_sc, m_sc, l_sc, acc_sc):
        kv = pl.program_id(1)

        @pl.when(kv == 0)
        def _():
            m_sc[...] = jnp.full_like(m_sc, NEG_INF)
            l_sc[...] = jnp.zeros_like(l_sc)
            acc_sc[...] = jnp.zeros_like(acc_sc)
            # Fold scale into q ONCE per q tile (hoisted out of the kv loop).
            q = q_ref[0]
            qs_sc[...] = q * scale_ref[0, 0].astype(q.dtype)

        k = k_ref[0]                                   # (tk, D)
        v = v_ref[0]                                   # (tk, D)

        # Contract the last dims of both operands directly (no explicit k.T).
        s = lax.dot_general(qs_sc[...], k, (((1,), (1,)), ((), ())),
                            preferred_element_type=jnp.float32)   # (tq, tk)

        if needs_mask:
            # Only the last kv tile can contain padded key rows.
            # TODO(synk): restrict to the last tile (lax.cond) to skip the
            # iota/compare/select on earlier tiles.
            col = kv * tk + lax.broadcasted_iota(jnp.int32, s.shape, 1)
            s = jnp.where(col < sk_actual, s, NEG_INF)

        m_prev = m_sc[...]
        m_new = jnp.maximum(m_prev, jnp.max(s, axis=-1, keepdims=True))
        alpha = jnp.exp(m_prev - m_new)
        p = jnp.exp(s - m_new)                         # (tq, tk) f32

        l_sc[...] = alpha * l_sc[...] + jnp.sum(p, axis=-1, keepdims=True)
        acc_sc[...] = alpha * acc_sc[...] + jnp.dot(
            p.astype(v.dtype), v, preferred_element_type=jnp.float32)
        m_sc[...] = m_new

        @pl.when(kv == pl.num_programs(1) - 1)
        def _():
            inv_l = pl.reciprocal(l_sc[...], approx=True)
            o_ref[0] = (acc_sc[...] * inv_l).astype(o_ref.dtype)

    return kernel


def _sdpa_flash(query, key, value, scale):
    B, Sq, D = query.shape
    _, Sk, _ = key.shape
    dt = query.dtype
    itemsize = jnp.dtype(dt).itemsize

    try:
        kind = jax.devices()[0].device_kind.lower()
    except Exception:  # pragma: no cover
        kind = ""
    big_mxu = ("v6" in kind) or ("v7" in kind)   # 256x256 MXU generations

    # Query tile.
    if Sq <= 128:
        tq = _round_up(Sq, 8)
    else:
        tq = 256 if big_mxu else 128
    Sq_pad = _round_up(Sq, tq)

    # KV tile: whole (128-aligned) K when short, else wide tiles to cut the
    # per-step acc read-modify-write and grid-step overhead.
    sk128 = _round_up(Sk, 128)
    if sk128 <= 1024:
        tk = sk128
    elif sk128 <= 4096:
        tk = 256
    else:
        tk = 512
    Sk_pad = _round_up(Sk, tk)

    n_q = Sq_pad // tq
    n_kv = Sk_pad // tk
    needs_mask = (Sk % tk) != 0

    qp = query if Sq_pad == Sq else jnp.pad(query, ((0, 0), (0, Sq_pad - Sq), (0, 0)))
    kp = key if Sk_pad == Sk else jnp.pad(key, ((0, 0), (0, Sk_pad - Sk), (0, 0)))
    vp = value if Sk_pad == Sk else jnp.pad(value, ((0, 0), (0, Sk_pad - Sk), (0, 0)))

    # Cost from the shapes actually fed to pallas_call.
    cost = pl.CostEstimate(
        flops=4 * B * Sq_pad * Sk_pad * D,
        transcendentals=B * Sq_pad * Sk_pad,
        bytes_accessed=(2 * B * Sq_pad * D + 2 * B * n_q * Sk_pad * D) * itemsize,
    )

    # Fold (B, n_q) into one leading parallel axis for better megacore balance.
    out = pl.pallas_call(
        _make_flash_kernel(Sk, tk, needs_mask),
        out_shape=jax.ShapeDtypeStruct((B, Sq_pad, D), dt),
        grid_spec=pltpu.PrefetchScalarGridSpec(
            num_scalar_prefetch=0,
            grid=(B * n_q, n_kv),
            in_specs=[
                pl.BlockSpec(memory_space=pltpu.SMEM),                             # scale
                pl.BlockSpec((1, tq, D), lambda bq, kv: (bq // n_q, bq % n_q, 0)),  # q
                pl.BlockSpec((1, tk, D), lambda bq, kv: (bq // n_q, kv, 0)),        # k
                pl.BlockSpec((1, tk, D), lambda bq, kv: (bq // n_q, kv, 0)),        # v
            ],
            out_specs=pl.BlockSpec((1, tq, D), lambda bq, kv: (bq // n_q, bq % n_q, 0)),
            scratch_shapes=[
                pltpu.VMEM((tq, D), dt),             # scaled q (hoisted out of kv loop)
                pltpu.VMEM((tq, 1), jnp.float32),    # running max m
                pltpu.VMEM((tq, 1), jnp.float32),    # running denom l
                pltpu.VMEM((tq, D), jnp.float32),    # output accumulator
            ],
        ),
        compiler_params=pltpu.CompilerParams(
            dimension_semantics=("parallel", "arbitrary"),
            vmem_limit_bytes=32 * 1024 * 1024,
        ),
        cost_estimate=cost,
    )(scale, qp, kp, vp)

    if Sq_pad != Sq:
        out = out[:, :Sq, :]
    return out


# ---------------------------------------------------------------------------
# Dispatcher + reference
# ---------------------------------------------------------------------------
def sdpa_pallas(query, key, value, scale_factor):
    """softmax(query @ key^T * scale_factor, axis=-1) @ value (dropout p = 0)."""
    B, Sq, D = query.shape
    Bk, Sk, Dk = key.shape
    assert (B, D) == (Bk, Dk) and value.shape == key.shape

    scale = jnp.asarray(scale_factor, dtype=jnp.float32).reshape(1, 1)

    single_pass = (Sq <= 512) and (_round_up(Sk, 128) <= 1024) and (D <= 512)
    if single_pass:
        return _sdpa_single_pass(query, key, value, scale)
    return _sdpa_flash(query, key, value, scale)


def sdpa_reference(query, key, value, scale_factor):
    qk = jnp.einsum("bqd,bkd->bqk", query, key) * scale_factor
    p = jax.nn.softmax(qk, axis=-1)
    # dropout p = 0.0 -> identity
    return jnp.einsum("bqk,bkd->bqd", p, value)


if __name__ == "__main__":
    # Shapes from the original module: query (5, 3, 4), key/value (5, 20, 4).
    B, Sq, Sk, D = 5, 3, 20, 4
    k0 = jax.random.PRNGKey(0)
    kq, kk, kv = jax.random.split(k0, 3)
    query = jax.random.normal(kq, (B, Sq, D), dtype=jnp.float32)
    key = jax.random.normal(kk, (B, Sk, D), dtype=jnp.float32)
    value = jax.random.normal(kv, (B, Sk, D), dtype=jnp.float32)

    # Parameter from __init__: scale_factor = torch.ones([]) -> scalar 1.0
    scale_factor = jnp.float32(1.0)

    out = jax.block_until_ready(sdpa_pallas(query, key, value, scale_factor))
    ref = sdpa_reference(query, key, value, scale_factor)
    assert out.shape == (B, Sq, D)
    assert jnp.allclose(out, ref, atol=1e-2, rtol=1e-2), "single-pass path mismatch"

    # Also exercise the flash (long-sequence) path at a modest size.
    B2, Sq2, Sk2, D2 = 2, 600, 1200, 64
    k1, k2, k3 = jax.random.split(jax.random.PRNGKey(1), 3)
    q2 = jax.random.normal(k1, (B2, Sq2, D2), dtype=jnp.float32)
    key2 = jax.random.normal(k2, (B2, Sk2, D2), dtype=jnp.float32)
    v2 = jax.random.normal(k3, (B2, Sk2, D2), dtype=jnp.float32)
    out2 = jax.block_until_ready(sdpa_pallas(q2, key2, v2, jnp.float32(0.125)))
    ref2 = sdpa_reference(q2, key2, v2, jnp.float32(0.125))
    assert out2.shape == (B2, Sq2, D2)
    assert jnp.allclose(out2, ref2, atol=1e-2, rtol=1e-2), "flash path mismatch"

    print("KERNEL_OK")
</pallas_src>

<mosaic_0001>
module attributes {stable_mosaic.version = 11 : i64} {
  func.func @_single_pass_kernel(%arg0: i32, %arg1: memref<1x1xf32, #tpu.memory_space<smem>>, %arg2: memref<5x3x4xf32, #tpu.memory_space<vmem>>, %arg3: memref<5x20x4xf32, #tpu.memory_space<vmem>>, %arg4: memref<5x20x4xf32, #tpu.memory_space<vmem>>, %arg5: memref<5x3x4xf32, #tpu.memory_space<vmem>>) attributes {dimension_semantics = [#tpu.dimension_semantics<parallel>], iteration_bounds = array<i64: 1>, scalar_prefetch = 0 : i64, scratch_operands = 0 : i64, tpu.core_type = #tpu.core_type<tc>, window_params = [{transform_indices = @transform_0, window_bounds = array<i64: 1, 1>}, {transform_indices = @transform_1, window_bounds = array<i64: 5, 3, 4>}, {transform_indices = @transform_2, window_bounds = array<i64: 5, 20, 4>}, {transform_indices = @transform_3, window_bounds = array<i64: 5, 20, 4>}, {transform_indices = @transform_4, window_bounds = array<i64: 5, 3, 4>}]} {
    %c0 = arith.constant 0 : index
    %c0_0 = arith.constant 0 : index
    %c0_1 = arith.constant 0 : index
    %0 = vector.load %arg2[%c0, %c0_0, %c0_1] : memref<5x3x4xf32, #tpu.memory_space<vmem>>, vector<5x3x4xf32>
    %c0_2 = arith.constant 0 : index
    %c0_3 = arith.constant 0 : index
    %c0_4 = arith.constant 0 : index
    %1 = vector.load %arg3[%c0_2, %c0_3, %c0_4] : memref<5x20x4xf32, #tpu.memory_space<vmem>>, vector<5x20x4xf32>
    %c0_5 = arith.constant 0 : index
    %c0_6 = arith.constant 0 : index
    %c0_7 = arith.constant 0 : index
    %2 = vector.load %arg4[%c0_5, %c0_6, %c0_7] : memref<5x20x4xf32, #tpu.memory_space<vmem>>, vector<5x20x4xf32>
    %c0_8 = arith.constant 0 : index
    %c0_9 = arith.constant 0 : index
    %3 = memref.load %arg1[%c0_8, %c0_9] : memref<1x1xf32, #tpu.memory_space<smem>>
    %4 = vector.broadcast %3 : f32 to vector<5x3x4xf32>
    %5 = arith.mulf %0, %4 : vector<5x3x4xf32>
    "tpu.trace_start"() <{level = 10 : i32, message = "bqd,bkd->bqk"}> : () -> ()
    %cst = arith.constant dense<0.000000e+00> : vector<5x3x20xf32>
    %6 = tpu.matmul %5, %1, %cst {dimension_numbers = #tpu.dot_dimension_numbers<[2], [2], [1], [1], [0, 0, 0, 1, 1, 1], [0], [0]>} : vector<5x3x4xf32>, vector<5x20x4xf32>, vector<5x3x20xf32> -> vector<5x3x20xf32>
    "tpu.trace_stop"() : () -> ()
    %cst_10 = arith.constant dense<0xFF800000> : vector<5x3xf32>
    %7 = vector.multi_reduction <maximumf>, %6, %cst_10 [2] : vector<5x3x20xf32> to vector<5x3xf32>
    %8 = vector.shape_cast %7 : vector<5x3xf32> to vector<5x3x1xf32>
    %9 = vector.broadcast %8 : vector<5x3x1xf32> to vector<5x3x20xf32>
    %10 = arith.subf %6, %9 : vector<5x3x20xf32>
    %11 = math.exp %10 : vector<5x3x20xf32>
    %cst_11 = arith.constant dense<0.000000e+00> : vector<5x3xf32>
    %12 = vector.multi_reduction <add>, %11, %cst_11 [2] : vector<5x3x20xf32> to vector<5x3xf32>
    %13 = vector.shape_cast %12 : vector<5x3xf32> to vector<5x3x1xf32>
    "tpu.trace_start"() <{level = 10 : i32, message = "bqk,bkd->bqd"}> : () -> ()
    %cst_12 = arith.constant dense<0.000000e+00> : vector<5x3x4xf32>
    %14 = tpu.matmul %11, %2, %cst_12 {dimension_numbers = #tpu.dot_dimension_numbers<[2], [1], [1], [2], [0, 0, 0, 1, 1, 2], [0], [0]>} : vector<5x3x20xf32>, vector<5x20x4xf32>, vector<5x3x4xf32> -> vector<5x3x4xf32>
    "tpu.trace_stop"() : () -> ()
    %15 = tpu.reciprocal %13 {approx = true} : vector<5x3x1xf32> -> vector<5x3x1xf32>
    %16 = vector.broadcast %15 : vector<5x3x1xf32> to vector<5x3x4xf32>
    %17 = arith.mulf %14, %16 : vector<5x3x4xf32>
    %c0_13 = arith.constant 0 : index
    %c0_14 = arith.constant 0 : index
    %c0_15 = arith.constant 0 : index
    %18 = vector.load %arg5[%c0_13, %c0_14, %c0_15] : memref<5x3x4xf32, #tpu.memory_space<vmem>>, vector<5x3x4xf32>
    tpu.vector_store %arg5[%c0_13, %c0_14, %c0_15], %17 {strides = array<i32>} : memref<5x3x4xf32, #tpu.memory_space<vmem>>, vector<5x3x4xf32>,
    return
  }
  func.func @transform_0(%arg0: i32) -> (i32, i32) {
    %c0_i32 = arith.constant 0 : i32
    %c0_i32_0 = arith.constant 0 : i32
    %c0_i32_1 = arith.constant 0 : i32
    return %c0_i32, %c0_i32_0 : i32, i32
  }
  func.func @transform_1(%arg0: i32) -> (i32, i32, i32) {
    %c0_i32 = arith.constant 0 : i32
    %c0_i32_0 = arith.constant 0 : i32
    %c0_i32_1 = arith.constant 0 : i32
    return %arg0, %c0_i32, %c0_i32_0 : i32, i32, i32
  }
  func.func @transform_2(%arg0: i32) -> (i32, i32, i32) {
    %c0_i32 = arith.constant 0 : i32
    %c0_i32_0 = arith.constant 0 : i32
    %c0_i32_1 = arith.constant 0 : i32
    return %arg0, %c0_i32, %c0_i32_0 : i32, i32, i32
  }
  func.func @transform_3(%arg0: i32) -> (i32, i32, i32) {
    %c0_i32 = arith.constant 0 : i32
    %c0_i32_0 = arith.constant 0 : i32
    %c0_i32_1 = arith.constant 0 : i32
    return %arg0, %c0_i32, %c0_i32_0 : i32, i32, i32
  }
  func.func @transform_4(%arg0: i32) -> (i32, i32, i32) {
    %c0_i32 = arith.constant 0 : i32
    %c0_i32_0 = arith.constant 0 : i32
    %c0_i32_1 = arith.constant 0 : i32
    return %arg0, %c0_i32, %c0_i32_0 : i32, i32, i32
  }
}

</mosaic_0001>

<bundles_post_ra>
// kernel: tpu_custom_call.1
= control target key start
LH: loop header
LB: loop body
LE: loop exit
PB: predicated region body
PF: predicated region fallthrough
CT: control target
= control target key end

     0   :  { %vm60_vm0 = vcmask 31744   ;;  %v1101_v0 = vmov 0.0   ;;  %vm1102_vm1 = vmmov 0   ;;  %vm471_vm2 = vcmask 157696   ;;  %s1346_s2 = inlined_call_operand.vmem [shape: f32[5,20,4], index: 2, kind: input, shape index: {}]   ;;  %s1347_s0 = inlined_call_operand.<no memory space> [shape: f32[1,1], index: 0, kind: input, shape index: {}]   ;;  %s1348_s1 = inlined_call_operand.vmem [shape: f32[5,3,4], index: 1, kind: input, shape index: {}]   ;;  %s1349_s3 = inlined_call_operand.vmem [shape: f32[5,20,4], index: 3, kind: input, shape index: {}]   ;;  %s1350_s4 = inlined_call_operand.vmem [shape: f32[5,3,4], index: 4, kind: output, shape index: {}]  }
   0x1   :  { %989 = vmatprep.subr.mxu0 %v1101_v0  ;;  %v25_v1 = vld [vmem:[%s1346_s2 + $0x10] sm:$0xf]  ;;  %998 = vmatprep.subr.mxu1 %v1101_v0  ;;  %v28_v2 = vld [vmem:[%s1346_s2 + $0x28] sm:$0xf]  ;;  %v27_v4 = vld [vmem:[%s1346_s2 + $0x20] sm:$0xff]  ;;  %v54_v6 = vstv %s1347_s0  ;;  %vm521_vm3 = vcmask 1043456  }
   0x2   :  { %990 = vmatpush3.xpose.msk.msra.mxu0 %vm60_vm0, %v25_v1  ;;  %999 = vmatpush3.xpose.msk.msra.mxu1 %vm60_vm0, %v28_v2  ;;  %v24_v3 = vld [vmem:[%s1346_s2 + $0x8] sm:$0xff]  ;;  %v18_v5 = vld [vmem:[%s1348_s1] sm:$0x7]  ;;  %v19_v7 = vld [vmem:[%s1348_s1 + $0x4] sm:$0x7]  ;;  %vm517_vm4 = vcmask 162816  }
   0x3   :  { %991 = vmatprep.subr.mxu0 %v1101_v0  ;;  %1000 = vmatprep.subr.mxu1 %v1101_v0  ;;  %v23_v8 = vld [vmem:[%s1346_s2] sm:$0xff]  ;;  %v26_v9 = vld [vmem:[%s1346_s2 + $0x18] sm:$0xff]  ;;  %v55_v10 = vmul.f32 %v54_v6, %v18_v5  ;;  %v56_v11 = vmul.f32 %v54_v6, %v19_v7  ;;  %v33_v15 = vld [vmem:[%s1346_s2 + $0x50] sm:$0xff]  ;;  %vm909_vm5 = vcmask 26624  }
   0x4   :  { %995 = vmatprep.mubr.msk.f32.mxu0 %vm1102_vm1, %v1101_v0  ;;  %1004 = vmatprep.mubr.msk.f32.mxu1 %vm1102_vm1, %v1101_v0  ;;  %v31_v12 = vld [vmem:[%s1346_s2 + $0x40] sm:$0xf]  ;;  %v34_v13 = vld [vmem:[%s1346_s2 + $0x58] sm:$0xf]  ;;  %v20_v16 = vld [vmem:[%s1348_s1 + $0x8] sm:$0x7] }
   0x5   :  { %v30_v14 = vld [vmem:[%s1346_s2 + $0x38] sm:$0xff]  ;;  %v21_v17 = vld [vmem:[%s1348_s1 + $0xc] sm:$0x7]  ;;  %v29_v18 = vld [vmem:[%s1346_s2 + $0x30] sm:$0xff]  ;;  %v57_v20 = vmul.f32 %v54_v6, %v20_v16 }
   0x6   :  { %992 = vmatpush3.xpose.msk.msra.mxu0 %vm60_vm0, %v24_v3  ;;  %1001 = vmatpush3.xpose.msk.msra.mxu1 %vm60_vm0, %v27_v4  ;;  %v32_v19 = vld [vmem:[%s1346_s2 + $0x48] sm:$0xff]  ;;  %v58_v21 = vmul.f32 %v54_v6, %v21_v17  ;;  %v37_v22 = vld [vmem:[%s1346_s2 + $0x70] sm:$0xf]  ;;  %v35_v25 = vld [vmem:[%s1346_s2 + $0x60] sm:$0xff] }
   0x7   :  { %993 = vmatprep.subr.mxu0 %v1101_v0  ;;  %1002 = vmatprep.subr.mxu1 %v1101_v0  ;;  %v36_v23 = vld [vmem:[%s1346_s2 + $0x68] sm:$0xff]  ;;  %v22_v24 = vld [vmem:[%s1348_s1 + $0x10] sm:$0x7]  ;;  %v38_v44 = vld [vmem:[%s1349_s3] sm:$0xff] }
   0x8   :  { %v59_v26 = vmul.f32 %v54_v6, %v22_v24  ;;  %v40_v39 = vld [vmem:[%s1349_s3 + $0x10] sm:$0xf]  ;;  %v39_v42 = vld [vmem:[%s1349_s3 + $0x8] sm:$0xff]  ;;  %v46_v45 = vld [vmem:[%s1349_s3 + $0x40] sm:$0xf] }
   0x9   :  { %v45_v46 = vld [vmem:[%s1349_s3 + $0x38] sm:$0xff]  ;;  %v44_v47 = vld [vmem:[%s1349_s3 + $0x30] sm:$0xff]  ;;  %v43_v59 = vld [vmem:[%s1349_s3 + $0x28] sm:$0xf] }
   0xa   :  { %994 = vmatpush3.xpose.msk.msra.mxu0 %vm60_vm0, %v23_v8  ;;  %1003 = vmatpush3.xpose.msk.msra.mxu1 %vm60_vm0, %v26_v9  ;;  %v42_v63 = vld [vmem:[%s1349_s3 + $0x20] sm:$0xff]  ;;  %v41_v1 = vld [vmem:[%s1349_s3 + $0x18] sm:$0xff]  ;;  %v48_v7 = vld [vmem:[%s1349_s3 + $0x50] sm:$0xff] }
   0xb   :  { %1007 = vmatprep.subr.mxu0 %v1101_v0  ;;  %1016 = vmatprep.subr.mxu1 %v1101_v0  ;;  %v49_v4 = vld [vmem:[%s1349_s3 + $0x58] sm:$0xf]  ;;  %v47_v9 = vld [vmem:[%s1349_s3 + $0x48] sm:$0xff] }
   0xd   :  { %996 = vmatmul.mubr.msk.f32.vlgmr.msra.gmra.mxu0 %vm60_vm0, %v55_v10  ;;  %1005 = vmatmul.mubr.msk.f32.vlgmr.msra.gmra.mxu1 %vm60_vm0, %v56_v11  ;;  %v52_v10 = vld [vmem:[%s1349_s3 + $0x70] sm:$0xf] }
   0xe   :  { %1008 = vmatpush3.xpose.msk.msra.mxu0 %vm60_vm0, %v31_v12  ;;  %1017 = vmatpush3.xpose.msk.msra.mxu1 %vm60_vm0, %v34_v13  ;;  %v51_v13 = vld [vmem:[%s1349_s3 + $0x68] sm:$0xff] }
   0xf   :  { %1009 = vmatprep.subr.mxu0 %v1101_v0  ;;  %1018 = vmatprep.subr.mxu1 %v1101_v0 }
  0x10   :  { %1013 = vmatprep.mubr.msk.f32.mxu0 %vm1102_vm1, %v1101_v0  ;;  %1022 = vmatprep.mubr.msk.f32.mxu1 %vm1102_vm1, %v1101_v0 }
  0x12   :  { %1010 = vmatpush3.xpose.msk.msra.mxu0 %vm60_vm0, %v30_v14  ;;  %1019 = vmatpush3.xpose.msk.msra.mxu1 %vm60_vm0, %v33_v15  ;;  %v50_v14 = vld [vmem:[%s1349_s3 + $0x60] sm:$0xff] }
  0x13   :  { %1011 = vmatprep.subr.mxu0 %v1101_v0  ;;  %1020 = vmatprep.subr.mxu1 %v1101_v0 }
  0x16   :  { %1012 = vmatpush3.xpose.msk.msra.mxu0 %vm60_vm0, %v29_v18  ;;  %1021 = vmatpush3.xpose.msk.msra.mxu1 %vm60_vm0, %v32_v19 }
  0x17   :  { %1025 = vmatprep.subr.mxu0 %v1101_v0  ;;  %1034 = vmatprep.subr.mxu1 %v1101_v0 }
  0x19   :  { %1014 = vmatmul.mubr.msk.f32.vlgmr.msra.gmra.mxu0 %vm60_vm0, %v57_v20  ;;  %1023 = vmatmul.mubr.msk.f32.vlgmr.msra.gmra.mxu1 %vm60_vm0, %v58_v21 }
  0x1a   :  { %1026 = vmatpush3.xpose.msk.msra.mxu0 %vm60_vm0, %v37_v22  ;;  %1031 = vmatprep.mubr.msk.f32.mxu0 %vm1102_vm1, %v1101_v0 }
  0x1b   :  { %1027 = vmatprep.subr.mxu0 %v1101_v0  ;;  %1040 = vmatprep.mubr.msk.f32.mxu1 %vm1102_vm1, %v1101_v0 }
  0x1c   :  { %1035 = vmatpush3.msk.msra.mxu1 %vm521_vm3, %v40_v39 }
  0x1d   :  { %1036 = vmatprep.subr.mxu1 %v1101_v0 }
  0x1e   :  { %1028 = vmatpush3.xpose.msk.msra.mxu0 %vm60_vm0, %v36_v23  ;;  %1037 = vmatpush3.msra.mxu1 %v39_v42 }
  0x1f   :  { %1029 = vmatprep.subr.mxu0 %v1101_v0  ;;  %1038 = vmatprep.subr.mxu1 %v1101_v0 }
  0x20   :  { %1039 = vmatpush3.msra.mxu1 %v38_v44 }
  0x21   :  { %1043 = vmatprep.subr.mxu1 %v1101_v0 }
  0x22   :  { %1030 = vmatpush3.xpose.msk.msra.mxu0 %vm60_vm0, %v35_v25 }
  0x23   :  { %1052 = vmatprep.subr.mxu0 %v1101_v0 }
  0x25   :  { %1032 = vmatmul.mubr.msk.f32.vlgmr.msra.gmra.mxu0 %vm60_vm0, %v59_v26 }
  0x26   :  { %1058 = vmatprep.mubr.msk.f32.mxu0 %vm1102_vm1, %v1101_v0  ;;  %1053 = vmatpush3.msk.msra.mxu0 %vm521_vm3, %v46_v45 }
  0x27   :  { %1054 = vmatprep.subr.mxu0 %v1101_v0 }
  0x28   :  { %1055 = vmatpush3.msra.mxu0 %v45_v46 }
  0x29   :  { %1056 = vmatprep.subr.mxu0 %v1101_v0 }
  0x2a   :  { %1057 = vmatpush3.msra.mxu0 %v44_v47 }
  0x2b   :  { %1070 = vmatprep.subr.mxu0 %v1101_v0 }
  0xcd   :  { %v139_v27 = vpop.f32.mrf.mxu0  ;;  %v221_v28 = vpop.f32.mrf.mxu1 }
  0xce   :  { %v472_v29 = vsel %vm471_vm2, %v139_v27, -inf  ;;  %v475_v32 = vsel %vm471_vm2, %v221_v28, -inf }
  0xcf   :  { %473 = vmax.xlane.f32.xlu0 %v472_v29  ;;  %v997_v30 = vpop.f32.mrf.mxu0  ;;  %v1006_v31 = vpop.f32.mrf.mxu1 }
  0xd3   :  { %476 = vmax.xlane.f32.xlu0 %v475_v32 }
  0xd9   :  { %v303_v33 = vpop.f32.mrf.mxu0  ;;  %v385_v34 = vpop.f32.mrf.mxu1 }
  0xda   :  { %v478_v35 = vsel %vm471_vm2, %v303_v33, -inf  ;;  %v481_v38 = vsel %vm471_vm2, %v385_v34, -inf }
  0xdb   :  { %479 = vmax.xlane.f32.xlu1 %v478_v35  ;;  %v1015_v36 = vpop.f32.mrf.mxu0  ;;  %v1024_v37 = vpop.f32.mrf.mxu1 }
  0xdf   :  { %482 = vmax.xlane.f32.xlu1 %v481_v38 }
  0xe5   :  { %v467_v40 = vpop.f32.mrf.mxu0 }
  0xe6   :  { %v484_v41 = vsel %vm471_vm2, %v467_v40, -inf }
  0xe7   :  { %485 = vmax.xlane.f32.xlu0 %v484_v41  ;;  %v1033_v43 = vpop.f32.mrf.mxu0 }
 0x158   :  { %v474_v48 = vpop.xlane.xlu0 %473 }
 0x159   :  { %v487_v49 = vsub.f32 %v139_v27, %v474_v48 }
 0x15b   :  { %v492_v50 = vmul.f32 1.442695, %v487_v49 }
 0x15c   :  { %v477_v51 = vpop.xlane.xlu0 %476 }
 0x15d   :  { %1081 = vpow2.f32 %v492_v50  ;;  %v488_v52 = vsub.f32 %v221_v28, %v477_v51 }
 0x15f   :  { %v494_v53 = vmul.f32 1.442695, %v488_v52 }
 0x161   :  { %1083 = vpow2.f32 %v494_v53 }
 0x164   :  { %v480_v54 = vpop.xlane.xlu1 %479 }
 0x165   :  { %v489_v55 = vsub.f32 %v303_v33, %v480_v54 }
 0x167   :  { %v496_v56 = vmul.f32 1.442695, %v489_v55 }
 0x168   :  { %v483_v57 = vpop.xlane.xlu1 %482 }
 0x169   :  { %1085 = vpow2.f32 %v496_v56  ;;  %v490_v58 = vsub.f32 %v385_v34, %v483_v57 }
 0x16a   :  { %v1082_v60 = vpop.eup %1081 }
 0x16b   :  { %v498_v61 = vmul.f32 1.442695, %v490_v58  ;;  %1041 = vmatmul.mubr.msk.f32.vlgmr.msra.gmra.mxu1 %vm517_vm4, %v1082_v60  ;;  %v502_v62 = vsel %vm471_vm2, %v1082_v60, 0.0 }
 0x16c   :  { %1044 = vmatpush3.msk.msra.mxu1 %vm521_vm3, %v43_v59  ;;  %503 = vadd.xlane.f32.xlu1 %v502_v62 }
 0x16d   :  { %1087 = vpow2.f32 %v498_v61  ;;  %1045 = vmatprep.subr.mxu1 %v1101_v0  ;;  %1049 = vmatprep.mubr.msk.f32.mxu1 %vm1102_vm1, %v1101_v0 }
 0x16e   :  { %v1084_v2 = vpop.eup %1083  ;;  %1046 = vmatpush3.msra.mxu1 %v42_v63 }
 0x16f   :  { %1047 = vmatprep.subr.mxu1 %v1101_v0  ;;  %v505_v3 = vsel %vm471_vm2, %v1084_v2, 0.0 }
 0x170   :  { %1048 = vmatpush3.msra.mxu1 %v41_v1  ;;  %506 = vadd.xlane.f32.xlu0 %v505_v3  ;;  %v486_v5 = vpop.xlane.xlu0 %485 }
 0x171   :  { %1050 = vmatmul.mubr.msk.f32.vlgmr.msra.gmra.mxu1 %vm517_vm4, %v1084_v2  ;;  %v491_v6 = vsub.f32 %v467_v40, %v486_v5  ;;  %1061 = vmatprep.subr.mxu1 %v1101_v0 }
 0x172   :  { %1062 = vmatpush3.msk.msra.mxu1 %vm521_vm3, %v49_v4  ;;  %1067 = vmatprep.mubr.msk.f32.mxu1 %vm1102_vm1, %v1101_v0 }
 0x173   :  { %v500_v8 = vmul.f32 1.442695, %v491_v6  ;;  %1063 = vmatprep.subr.mxu1 %v1101_v0 }
 0x174   :  { %1064 = vmatpush3.msra.mxu1 %v48_v7 }
 0x175   :  { %1089 = vpow2.f32 %v500_v8  ;;  %1065 = vmatprep.subr.mxu1 %v1101_v0 }
 0x176   :  { %v1086_v11 = vpop.eup %1085  ;;  %1066 = vmatpush3.msra.mxu1 %v47_v9 }
 0x177   :  { %1059 = vmatmul.mubr.msk.f32.vlgmr.msra.gmra.mxu0 %vm517_vm4, %v1086_v11  ;;  %v508_v12 = vsel %vm471_vm2, %v1086_v11, 0.0 }
 0x178   :  { %509 = vadd.xlane.f32.xlu1 %v508_v12  ;;  %1071 = vmatpush3.msk.msra.mxu0 %vm521_vm3, %v52_v10 }
 0x179   :  { %1072 = vmatprep.subr.mxu0 %v1101_v0  ;;  %1076 = vmatprep.mubr.msk.f32.mxu0 %vm1102_vm1, %v1101_v0 }
 0x17a   :  { %v1088_v15 = vpop.eup %1087  ;;  %1073 = vmatpush3.msra.mxu0 %v51_v13 }
 0x17b   :  { %1068 = vmatmul.mubr.msk.f32.vlgmr.msra.gmra.mxu1 %vm517_vm4, %v1088_v15  ;;  %v511_v16 = vsel %vm471_vm2, %v1088_v15, 0.0  ;;  %1074 = vmatprep.subr.mxu0 %v1101_v0 }
 0x17c   :  { %512 = vadd.xlane.f32.xlu0 %v511_v16  ;;  %1075 = vmatpush3.msra.mxu0 %v50_v14 }
 0x182   :  { %v1090_v17 = vpop.eup %1089 }
 0x183   :  { %1077 = vmatmul.mubr.msk.f32.vlgmr.msra.gmra.mxu0 %vm517_vm4, %v1090_v17  ;;  %v514_v18 = vsel %vm471_vm2, %v1090_v17, 0.0 }
 0x184   :  { %515 = vadd.xlane.f32.xlu1 %v514_v18 }
 0x1f5   :  { %v504_v19 = vpop.xlane.xlu1 %503 }
 0x1f6   :  { %1091 = vrcp.f32 %v504_v19 }
 0x1f9   :  { %v507_v20 = vpop.xlane.xlu0 %506 }
 0x1fa   :  { %1093 = vrcp.f32 %v507_v20 }
 0x201   :  { %v510_v21 = vpop.xlane.xlu1 %509 }
 0x202   :  { %1095 = vrcp.f32 %v510_v21 }
 0x203   :  { %v1092_v22 = vpop.eup %1091 }
 0x205   :  { %v513_v23 = vpop.xlane.xlu0 %512 }
 0x206   :  { %1097 = vrcp.f32 %v513_v23 }
 0x207   :  { %v1094_v26 = vpop.eup %1093 }
 0x20d   :  { %v516_v29 = vpop.xlane.xlu1 %515 }
 0x20e   :  { %1099 = vrcp.f32 %v516_v29 }
 0x20f   :  { %v1096_v31 = vpop.eup %1095 }
 0x213   :  { %v1098_v35 = vpop.eup %1097 }
 0x21b   :  { %v1100_v39 = vpop.eup %1099 }
 0x22b   :  { %v591_v24 = vpop.f32.mrf.mxu1 }
 0x22c   :  { %v904_v25 = vmul.f32 %v1092_v22, %v591_v24 }
 0x22d   :  { %v1042_v0 = vpop.f32.mrf.mxu1 }
 0x22e   :  { %910 = vst.msk [vmem:[%s1350_s4] sm:$0x7] %vm909_vm5, %v904_v25 }
 0x231   :  { %v667_v27 = vpop.f32.mrf.mxu1 }
 0x232   :  { %v905_v28 = vmul.f32 %v1094_v26, %v667_v27 }
 0x233   :  { %v1051_v30 = vpop.f32.mrf.mxu1 }
 0x234   :  { %911 = vst.msk [vmem:[%s1350_s4 + $0x4] sm:$0x7] %vm909_vm5, %v905_v28 }
 0x237   :  { %v743_v32 = vpop.f32.mrf.mxu0 }
 0x238   :  { %v906_v33 = vmul.f32 %v1096_v31, %v743_v32 }
 0x239   :  { %v1060_v34 = vpop.f32.mrf.mxu0 }
 0x23a   :  { %912 = vst.msk [vmem:[%s1350_s4 + $0x8] sm:$0x7] %vm909_vm5, %v906_v33 }
 0x23b   :  { %v819_v36 = vpop.f32.mrf.mxu1 }
 0x23c   :  { %v907_v37 = vmul.f32 %v1098_v35, %v819_v36 }
 0x23d   :  { %v1069_v38 = vpop.f32.mrf.mxu1 }
 0x23e   :  { %913 = vst.msk [vmem:[%s1350_s4 + $0xc] sm:$0x7] %vm909_vm5, %v907_v37 }
 0x243   :  { %v895_v40 = vpop.f32.mrf.mxu0 }
 0x244   :  { %v908_v41 = vmul.f32 %v1100_v39, %v895_v40 }
 0x245   :  { %v1078_v42 = vpop.f32.mrf.mxu0 }
 0x246   :  { %914 = vst.msk [vmem:[%s1350_s4 + $0x10] sm:$0x7] %vm909_vm5, %v908_v41 }

</bundles_post_ra>
